<compile_context>
chip_gen: v7x
topology: tpu7x:2x2x1
jax: 0.10.0
libtpu: 0.0.40
codegen_flags: <defaults>
</compile_context>

<pallas_src>
import jax
import jax.numpy as jnp
from jax.experimental import pallas as pl
from jax.experimental.pallas import tpu as pltpu


def _round_up(x: int, m: int) -> int:
    return ((x + m - 1) // m) * m


def _dot_add_kernel(v1_ref, inp_ref, o_ref):
    # v1 is a precomputed scalar living in SMEM; the body is a pure
    # load -> broadcast-add -> store stream on lane-dense (tm, tn) tiles.
    v1 = v1_ref[0, 0]
    o_ref[...] = (inp_ref[...].astype(jnp.float32) + v1).astype(o_ref.dtype)


def dot_add(
    x1,
    x2,
    inp,
    *,
    tm_cap: int = 512,
    tn_cap: int = 1024,
    small_bytes_threshold: int = 1 << 20,
    force_pallas: bool = False,
):
    """v2 = dot(x1, x2) + inp.  Pallas TPU kernel for the broadcast-add."""
    assert x1.ndim == 1 and x2.ndim == 1 and x1.shape == x2.shape
    assert inp.ndim == 2
    r, c = inp.shape

    # Scalar dot computed once (f32 accumulation, matches torch.dot).
    v1 = jnp.dot(x1.astype(jnp.float32), x2.astype(jnp.float32))

    # Small-problem fast path: kernel-launch + wrapper overhead would dwarf
    # the nanoseconds of actual work; let XLA fuse it.
    inp_bytes = r * c * jnp.dtype(inp.dtype).itemsize
    if inp_bytes < small_bytes_threshold and not force_pallas:
        return (inp.astype(jnp.float32) + v1).astype(inp.dtype)

    v1_smem = v1.reshape(1, 1)  # (1,1) scalar passed through SMEM

    # ---- Tile selection ----------------------------------------------------
    # Each block dim is either a multiple of (8, 128) or equal to the full
    # array dim (both satisfy the Mosaic block constraint).  No whole-array
    # padding; ragged edge tiles get masked stores.
    tm = min(_round_up(r, 8), tm_cap)
    if tm >= r:
        tm = r
    tn = min(_round_up(c, 128), tn_cap)
    if tn >= c:
        tn = c

    grid_r = pl.cdiv(r, tm)
    grid_c = pl.cdiv(c, tn)

    # v7x megacore: if the grid collapsed to a single tile but the row axis
    # can be split, split it so both TensorCores get work.
    if grid_r == 1 and grid_c == 1 and r >= 16:
        tm = max(8, _round_up((r + 1) // 2, 8))
        grid_r = pl.cdiv(r, tm)

    out = pl.pallas_call(
        _dot_add_kernel,
        out_shape=jax.ShapeDtypeStruct((r, c), inp.dtype),
        grid=(grid_r, grid_c),
        in_specs=[
            # Hoisted scalar dot result: whole (1,1) array in SMEM.
            pl.BlockSpec(memory_space=pltpu.MemorySpace.SMEM),
            # inp: tiled, double-buffered by the Pallas pipeline.
            pl.BlockSpec((tm, tn), lambda i, j: (i, j)),
        ],
        out_specs=pl.BlockSpec((tm, tn), lambda i, j: (i, j)),
        compiler_params=pltpu.CompilerParams(
            dimension_semantics=("parallel", "parallel"),
        ),
    )(v1_smem, inp)
    return out


if __name__ == "__main__":
    key = jax.random.PRNGKey(0)
    k1, k2, k3 = jax.random.split(key, 3)

    N = 32  # vector length (hidden=32)
    R = 8   # rows of `inp`

    x1 = jax.random.normal(k1, (N,), dtype=jnp.float32)
    x2 = jax.random.normal(k2, (N,), dtype=jnp.float32)
    inp = jax.random.normal(k3, (R, N), dtype=jnp.float32)

    # Force the Pallas path so the kernel itself is exercised at this tiny
    # shape (the default fast path would handle it in plain XLA).
    out = dot_add(x1, x2, inp, force_pallas=True)
    jax.block_until_ready(out)

    ref = jnp.dot(x1, x2) + inp
    assert out.shape == ref.shape, "shape mismatch vs reference"
    assert jnp.allclose(out, ref, atol=1e-5, rtol=1e-5), "mismatch vs reference"

    # Also exercise the small-problem fast path once.
    out_fast = dot_add(x1, x2, inp)
    jax.block_until_ready(out_fast)
    assert jnp.allclose(out_fast, ref, atol=1e-5, rtol=1e-5), "fast path mismatch"

    print("KERNEL_OK")
</pallas_src>

<mosaic_0001>
module attributes {stable_mosaic.version = 11 : i64} {
  func.func @_dot_add_kernel(%arg0: i32, %arg1: i32, %arg2: memref<1x1xf32, #tpu.memory_space<smem>>, %arg3: memref<8x32xf32, #tpu.memory_space<vmem>>, %arg4: memref<8x32xf32, #tpu.memory_space<vmem>>) attributes {dimension_semantics = [#tpu.dimension_semantics<parallel>, #tpu.dimension_semantics<parallel>], iteration_bounds = array<i64: 1, 1>, scalar_prefetch = 0 : i64, scratch_operands = 0 : i64, tpu.core_type = #tpu.core_type<tc>, window_params = [{transform_indices = @transform_0, window_bounds = array<i64: 1, 1>}, {transform_indices = @transform_1, window_bounds = array<i64: 8, 32>}, {transform_indices = @transform_2, window_bounds = array<i64: 8, 32>}]} {
    %c0 = arith.constant 0 : index
    %c0_0 = arith.constant 0 : index
    %0 = memref.load %arg2[%c0, %c0_0] : memref<1x1xf32, #tpu.memory_space<smem>>
    %c0_1 = arith.constant 0 : index
    %c0_2 = arith.constant 0 : index
    %1 = vector.load %arg3[%c0_1, %c0_2] : memref<8x32xf32, #tpu.memory_space<vmem>>, vector<8x32xf32>
    %2 = vector.broadcast %0 : f32 to vector<8x32xf32>
    %3 = arith.addf %1, %2 : vector<8x32xf32>
    %c0_3 = arith.constant 0 : index
    %c0_4 = arith.constant 0 : index
    %4 = vector.load %arg4[%c0_3, %c0_4] : memref<8x32xf32, #tpu.memory_space<vmem>>, vector<8x32xf32>
    tpu.vector_store %arg4[%c0_3, %c0_4], %3 {strides = array<i32>} : memref<8x32xf32, #tpu.memory_space<vmem>>, vector<8x32xf32>,
    return
  }
  func.func @transform_0(%arg0: i32, %arg1: i32) -> (i32, i32) {
    %c0_i32 = arith.constant 0 : i32
    %c0_i32_0 = arith.constant 0 : i32
    %c0_i32_1 = arith.constant 0 : i32
    return %c0_i32, %c0_i32_0 : i32, i32
  }
  func.func @transform_1(%arg0: i32, %arg1: i32) -> (i32, i32) {
    %c0_i32 = arith.constant 0 : i32
    return %arg0, %arg1 : i32, i32
  }
  func.func @transform_2(%arg0: i32, %arg1: i32) -> (i32, i32) {
    %c0_i32 = arith.constant 0 : i32
    return %arg0, %arg1 : i32, i32
  }
}

</mosaic_0001>

<bundles_post_ra>
// kernel: tpu_custom_call.1
= control target key start
LH: loop header
LB: loop body
LE: loop exit
PB: predicated region body
PF: predicated region fallthrough
CT: control target
= control target key end

     0   :  { %8 = vsyncpa [#allocation4], 0  ;;  %s140_s0 = inlined_call_operand.<no memory space> [shape: f32[1,1], index: 0, kind: input, shape index: {}]   ;;  %s141_s1 = inlined_call_operand.hbm [shape: f32[8,32], index: 1, kind: input, shape index: {}]   ;;  %s142_s2 = inlined_call_operand.hbm [shape: f32[8,32], index: 2, kind: output, shape index: {}]  }
   0x1   :  { %9 = vsyncpa [#allocation5], 0  ;;  %s96_s9 = smov [#allocation3]   ;;  %s48_s13 = scalar_lea.hbm %s141_s1, 128 }
   0x2   :  { %s18_s10 = sshll.u32 %s96_s9, 4  ;;  %p49_p0 = scmp.ne.s32.totalorder %s141_s1, %s48_s13  ;;  %s19_s10 = int_to_ptr.vmem [resolvable:$true] %s18_s10 }
   0x3   :  { %p52_p1 = scmp.lt.u32.totalorder %s48_s13, %s141_s1 }
   0x5   :  { %p54_p2 = pnand %p52_p1, %p49_p0 }
   0x7   :  { %57 = shalt.err (!%p54_p2)
}
   0x8   :  { %s58_s18 = scalar_lea.vmem %s19_s10, 128  ;;  %p63_p4 = scmp.lt.s32.totalorder %s19_s10, %s19_s10 }
   0x9   :  { %p59_p3 = scmp.ne.s32.totalorder %s19_s10, %s58_s18  ;;  %p64_p5 = scmp.lt.s32.totalorder %s58_s18, %s58_s18 }
   0xb   :  { %p65_p6 = por %p64_p5, %p63_p4 }
   0xd   :  { %p66_p7 = pnand %p65_p6, %p59_p3 }
   0xf   :  { %69 = shalt.err (!%p66_p7)
}
  0x10   :  { %21 = dma.hbm_to_vmem [thread:$0]  %s141_s1, 128, %s19_s10, [#allocation4]  }
  0x11   :  { %92 = dma.done.wait [#allocation4], 128  }
  0x12   :  { %93 = vsyncadd [#allocation4], 4294967168  ;;  %v27_v0 = vstv %s140_s0  ;;  %s97_s23 = smov [#allocation6]   ;;  %v26_v1 = vld [vmem:[#allocation3] sm:$0xff]  ;;  %vm29_vm0 = vcmask 261120  }
  0x13   :  { %s37_s24 = sshll.u32 %s97_s23, 4  ;;  %v28_v2 = vadd.f32 %v27_v0, %v26_v1  ;;  %s38_s24 = int_to_ptr.vmem [resolvable:$true] %s37_s24 }
  0x14   :  { %s70_s25 = scalar_lea.vmem %s38_s24, 128  ;;  %p75_p9 = scmp.lt.s32.totalorder %s38_s24, %s38_s24 }
  0x15   :  { %30 = vst.msk [vmem:[#allocation6] sm:$0xff] %vm29_vm0, %v28_v2  ;;  %p71_p8 = scmp.ne.s32.totalorder %s38_s24, %s70_s25  ;;  %p76_p10 = scmp.lt.s32.totalorder %s70_s25, %s70_s25 }
  0x17   :  { %p77_p11 = por %p76_p10, %p75_p9 }
  0x19   :  { %p78_p12 = pnand %p77_p11, %p71_p8 }
  0x1b   :  { %81 = shalt.err (!%p78_p12)
}
  0x1c   :  { %s82_s27 = scalar_lea.hbm %s142_s2, 128 }
  0x1d   :  { %p83_p13 = scmp.ne.s32.totalorder %s142_s2, %s82_s27  ;;  %p86_p0 = scmp.lt.u32.totalorder %s82_s27, %s142_s2 }
  0x1f   :  { %p88_p1 = pnand %p86_p0, %p83_p13 }
  0x21   :  { %91 = shalt.err (!%p88_p1)
}
  0x22   :  { %40 = dma.vmem_to_hbm [thread:$0]  %s38_s24, 128, %s142_s2, [#allocation5]  }
  0x23   :  { %94 = dma.done.wait [#allocation5], 128  }
  0x24   :  { %95 = vsyncadd [#allocation5], 4294967168 }
  0x25   :  { %44 = vsyncpa [#allocation4], 1 }
  0x26   :  { %45 = vsyncpa [#allocation5], 1 }

</bundles_post_ra>
